<compile_context>
chip_gen: v6e
topology: v6e:2x2x1
jax: 0.10.0
libtpu: 0.0.40
codegen_flags: <defaults>
</compile_context>

<pallas_src>
import jax
import jax.numpy as jnp
from jax import lax
from jax.experimental import pallas as pl
from jax.experimental.pallas import tpu as pltpu

_LANE = 128


def _round_up(n, m):
    return (n + m - 1) // m * m


def _dumbconvnet_kernel(x_ref, wconv_ref, scale_ref, shift_ref, pool_ref,
                        wfc_ref, bfc_ref, out_ref):
    """Single-invocation kernel (whole batch at once).

    x_ref:     (B*T, KMp)  bf16  im2col'ed, zero-padded spectrogram slab
    wconv_ref: (KMp, Hp)   bf16  conv weight as one matmul operand
    scale_ref: (1, Hp)     f32   folded BN scale  (gamma / sqrt(var + eps))
    shift_ref: (1, Hp)     f32   folded BN shift  (beta + (b_conv - mean)*scale)
    pool_ref:  (B, B*T)    f32   per-batch mean-pool matrix (1/T blocks)
    wfc_ref:   (Hp, Ep)    bf16  linear weight (transposed, zero-padded)
    bfc_ref:   (1, Ep)     f32   linear bias (zero-padded)
    out_ref:   (B, Ep)     f32   L2-normalized embeddings (padded lanes are 0)
    """
    # --- Conv1d ('same' padding) as ONE fused im2col matmul, f32 accumulate ---
    acc = jnp.dot(x_ref[...], wconv_ref[...],
                  preferred_element_type=jnp.float32)            # (B*T, Hp)

    # --- BatchNorm1d (eval, folded) + ReLU (f32 on the VPU) ---
    y = jnp.maximum(acc * scale_ref[...] + shift_ref[...], 0.0)  # (B*T, Hp)

    # --- AdaptiveAvgPool1d(1) over time, commuted ahead of the Linear ---
    emb_h = jnp.dot(pool_ref[...], y,
                    preferred_element_type=jnp.float32)          # (B, Hp)

    # --- Linear(hidden -> embedding), bf16 operands, f32 accumulate ---
    emb = jnp.dot(emb_h.astype(wfc_ref.dtype), wfc_ref[...],
                  preferred_element_type=jnp.float32) + bfc_ref[...]   # (B, Ep)

    # --- F.normalize(p=2, dim=1), eps = 1e-12 (rsqrt on the EUP) ---
    sumsq = jnp.sum(emb * emb, axis=1, keepdims=True)
    out_ref[...] = emb * lax.rsqrt(jnp.maximum(sumsq, 1e-24))


def dumbconvnet_forward(x_bmt, w_conv, b_conv, bn_gamma, bn_beta, bn_mean,
                        bn_var, w_fc, b_fc, *, kernel_size=3, bn_eps=1e-5):
    """x_bmt: [B, M, T] float32 (PyTorch layout).  Returns [B, E]."""
    B, M, T = x_bmt.shape
    K = kernel_size
    assert K % 2 == 1, "'same' padding fold below assumes odd kernel_size"
    pad = (K - 1) // 2
    H = w_conv.shape[0]            # w_conv: [H, M, K] (PyTorch Conv1d layout)
    E = w_fc.shape[0]              # w_fc:   [E, H]    (PyTorch Linear layout)

    KM = K * M
    KMp = _round_up(KM, _LANE)
    Hp = _round_up(H, _LANE)
    Ep = _round_up(E, _LANE)

    # ---------------- wrapper-side layout glue (plain XLA) ----------------
    # channels-last + 'same' zero padding in time
    x = jnp.transpose(x_bmt, (0, 2, 1))                          # [B, T, M]
    x = jnp.pad(x, ((0, 0), (pad, pad), (0, 0)))                 # [B, T+K-1, M]
    # im2col: one fused slab so the conv is a single MXU matmul
    x_cat = jnp.concatenate([x[:, k:k + T, :] for k in range(K)],
                            axis=-1)                             # [B, T, K*M]
    x_cat = jnp.pad(x_cat, ((0, 0), (0, 0), (0, KMp - KM)))
    x_cat = x_cat.reshape(B * T, KMp).astype(jnp.bfloat16)       # [B*T, KMp]

    # conv weight [H, M, K] -> [K*M, H], zero-padded, bf16
    w_kmh = jnp.transpose(w_conv, (2, 1, 0)).reshape(KM, H)
    w_kmh = jnp.pad(w_kmh, ((0, KMp - KM), (0, Hp - H))).astype(jnp.bfloat16)

    # fold conv bias + eval-mode BatchNorm into per-channel scale/shift (f32)
    # TODO(synk): training-mode BatchNorm1d batch statistics are not reproduced.
    inv_std = bn_gamma / jnp.sqrt(bn_var + bn_eps)
    scale = jnp.pad(inv_std, (0, Hp - H)).reshape(1, Hp).astype(jnp.float32)
    shift = jnp.pad(bn_beta + (b_conv - bn_mean) * inv_std,
                    (0, Hp - H)).reshape(1, Hp).astype(jnp.float32)

    # per-batch mean-pool over time as a (B, B*T) matmul (commuted before FC)
    pool = (jnp.repeat(jnp.eye(B, dtype=jnp.float32), T, axis=1) / T)  # (B, B*T)

    # FC weight/bias, transposed + zero-padded (padded E lanes stay exactly 0)
    w_fc_he = jnp.pad(jnp.transpose(w_fc, (1, 0)),
                      ((0, Hp - H), (0, Ep - E))).astype(jnp.bfloat16)
    b_fc_p = jnp.pad(b_fc, (0, Ep - E)).reshape(1, Ep).astype(jnp.float32)

    out_padded = pl.pallas_call(
        _dumbconvnet_kernel,
        out_shape=jax.ShapeDtypeStruct((B, Ep), jnp.float32),
        in_specs=[pl.BlockSpec(memory_space=pltpu.MemorySpace.VMEM)] * 7,
        out_specs=pl.BlockSpec(memory_space=pltpu.MemorySpace.VMEM),
    )(x_cat, w_kmh, scale, shift, pool, w_fc_he, b_fc_p)

    return out_padded[:, :E]


def _reference_forward(x_bmt, w_conv, b_conv, bn_gamma, bn_beta, bn_mean,
                       bn_var, w_fc, b_fc, *, kernel_size=3, bn_eps=1e-5):
    """Pure-JAX f32 reference mirroring the PyTorch forward (eval-mode BN)."""
    pad = (kernel_size - 1) // 2
    y = jax.lax.conv_general_dilated(
        x_bmt, w_conv, window_strides=(1,), padding=[(pad, pad)],
        dimension_numbers=("NCH", "OIH", "NCH"))
    y = y + b_conv[None, :, None]
    y = (y - bn_mean[None, :, None]) / jnp.sqrt(bn_var[None, :, None] + bn_eps)
    y = y * bn_gamma[None, :, None] + bn_beta[None, :, None]
    y = jnp.maximum(y, 0.0)                                      # [B, H, T]
    z = jnp.einsum("bht,eh->bte", y, w_fc) + b_fc                # [B, T, E]
    emb = jnp.mean(z, axis=1)                                    # [B, E]
    nrm = jnp.maximum(jnp.linalg.norm(emb, axis=1, keepdims=True), 1e-12)
    return emb / nrm


if __name__ == "__main__":
    # Small shapes consistent with the module's forward: [B, M, T] input.
    B, M, T = 2, 4, 16          # batch, n_mels, time frames
    H, E, K = 32, 16, 3         # hidden_size, embedding_size, kernel_size

    key = jax.random.PRNGKey(0)
    ks = jax.random.split(key, 8)
    x = jax.random.normal(ks[0], (B, M, T), dtype=jnp.float32)

    # Deterministic synthetic parameters (PyTorch param shapes).
    w_conv = 0.1 * jax.random.normal(ks[1], (H, M, K), dtype=jnp.float32)
    b_conv = 0.1 * jax.random.normal(ks[2], (H,), dtype=jnp.float32)
    bn_gamma = 1.0 + 0.05 * jax.random.normal(ks[3], (H,), dtype=jnp.float32)
    bn_beta = 0.05 * jax.random.normal(ks[4], (H,), dtype=jnp.float32)
    bn_mean = 0.01 * jax.random.normal(ks[5], (H,), dtype=jnp.float32)
    bn_var = jnp.abs(1.0 + 0.05 * jax.random.normal(ks[6], (H,),
                                                    dtype=jnp.float32))
    w_fc = 0.1 * jax.random.normal(ks[7], (E, H), dtype=jnp.float32)
    b_fc = jnp.linspace(-0.1, 0.1, E, dtype=jnp.float32)

    out = dumbconvnet_forward(x, w_conv, b_conv, bn_gamma, bn_beta, bn_mean,
                              bn_var, w_fc, b_fc, kernel_size=K)
    out = jax.block_until_ready(out)

    ref = _reference_forward(x, w_conv, b_conv, bn_gamma, bn_beta, bn_mean,
                             bn_var, w_fc, b_fc, kernel_size=K)
    assert out.shape == (B, E)
    # bf16 matmul operands (f32 accumulation) -> loosened tolerance vs f32 ref.
    assert jnp.allclose(out, ref, atol=2e-2, rtol=2e-2), "mismatch vs reference"

    print("KERNEL_OK")
</pallas_src>

<mosaic_0001>
module attributes {stable_mosaic.version = 11 : i64} {
  func.func @_dumbconvnet_kernel(%arg0: memref<32x128xbf16, #tpu.memory_space<vmem>>, %arg1: memref<128x128xbf16, #tpu.memory_space<vmem>>, %arg2: memref<1x128xf32, #tpu.memory_space<vmem>>, %arg3: memref<1x128xf32, #tpu.memory_space<vmem>>, %arg4: memref<2x32xf32, #tpu.memory_space<vmem>>, %arg5: memref<128x128xbf16, #tpu.memory_space<vmem>>, %arg6: memref<1x128xf32, #tpu.memory_space<vmem>>, %arg7: memref<2x128xf32, #tpu.memory_space<vmem>>) attributes {dimension_semantics = [], scalar_prefetch = 0 : i64, scratch_operands = 0 : i64, tpu.core_type = #tpu.core_type<tc>} {
    %c0 = arith.constant 0 : index
    %c0_0 = arith.constant 0 : index
    %0 = vector.load %arg0[%c0, %c0_0] : memref<32x128xbf16, #tpu.memory_space<vmem>>, vector<32x128xbf16>
    %c0_1 = arith.constant 0 : index
    %c0_2 = arith.constant 0 : index
    %1 = vector.load %arg1[%c0_1, %c0_2] : memref<128x128xbf16, #tpu.memory_space<vmem>>, vector<128x128xbf16>
    %cst = arith.constant dense<0.000000e+00> : vector<32x128xf32>
    %2 = tpu.matmul %0, %1, %cst {dimension_numbers = #tpu.dot_dimension_numbers<[1], [0], [0], [1], [0, 0, 1, 1], [], []>} : vector<32x128xbf16>, vector<128x128xbf16>, vector<32x128xf32> -> vector<32x128xf32>
    %c0_3 = arith.constant 0 : index
    %c0_4 = arith.constant 0 : index
    %3 = vector.load %arg2[%c0_3, %c0_4] : memref<1x128xf32, #tpu.memory_space<vmem>>, vector<1x128xf32>
    %4 = vector.broadcast %3 : vector<1x128xf32> to vector<32x128xf32>
    %5 = arith.mulf %2, %4 : vector<32x128xf32>
    %c0_5 = arith.constant 0 : index
    %c0_6 = arith.constant 0 : index
    %6 = vector.load %arg3[%c0_5, %c0_6] : memref<1x128xf32, #tpu.memory_space<vmem>>, vector<1x128xf32>
    %7 = vector.broadcast %6 : vector<1x128xf32> to vector<32x128xf32>
    %8 = arith.addf %5, %7 : vector<32x128xf32>
    %cst_7 = arith.constant 0.000000e+00 : f32
    %9 = vector.broadcast %cst_7 : f32 to vector<32x128xf32>
    %10 = arith.maximumf %8, %9 : vector<32x128xf32>
    %c0_8 = arith.constant 0 : index
    %c0_9 = arith.constant 0 : index
    %11 = vector.load %arg4[%c0_8, %c0_9] : memref<2x32xf32, #tpu.memory_space<vmem>>, vector<2x32xf32>
    %cst_10 = arith.constant dense<0.000000e+00> : vector<2x128xf32>
    %12 = tpu.matmul %11, %10, %cst_10 {dimension_numbers = #tpu.dot_dimension_numbers<[1], [0], [0], [1], [0, 0, 1, 1], [], []>} : vector<2x32xf32>, vector<32x128xf32>, vector<2x128xf32> -> vector<2x128xf32>
    %13 = arith.truncf %12 : vector<2x128xf32> to vector<2x128xbf16>
    %c0_11 = arith.constant 0 : index
    %c0_12 = arith.constant 0 : index
    %14 = vector.load %arg5[%c0_11, %c0_12] : memref<128x128xbf16, #tpu.memory_space<vmem>>, vector<128x128xbf16>
    %cst_13 = arith.constant dense<0.000000e+00> : vector<2x128xf32>
    %15 = tpu.matmul %13, %14, %cst_13 {dimension_numbers = #tpu.dot_dimension_numbers<[1], [0], [0], [1], [0, 0, 1, 1], [], []>} : vector<2x128xbf16>, vector<128x128xbf16>, vector<2x128xf32> -> vector<2x128xf32>
    %c0_14 = arith.constant 0 : index
    %c0_15 = arith.constant 0 : index
    %16 = vector.load %arg6[%c0_14, %c0_15] : memref<1x128xf32, #tpu.memory_space<vmem>>, vector<1x128xf32>
    %17 = vector.broadcast %16 : vector<1x128xf32> to vector<2x128xf32>
    %18 = arith.addf %15, %17 : vector<2x128xf32>
    %19 = arith.mulf %18, %18 : vector<2x128xf32>
    %cst_16 = arith.constant dense<0.000000e+00> : vector<2xf32>
    %20 = vector.multi_reduction <add>, %19, %cst_16 [1] : vector<2x128xf32> to vector<2xf32>
    %21 = vector.shape_cast %20 : vector<2xf32> to vector<2x1xf32>
    %cst_17 = arith.constant 1.000000e-24 : f32
    %22 = vector.broadcast %cst_17 : f32 to vector<2x1xf32>
    %23 = arith.maximumf %21, %22 : vector<2x1xf32>
    %24 = math.rsqrt %23 : vector<2x1xf32>
    %25 = vector.broadcast %24 : vector<2x1xf32> to vector<2x128xf32>
    %26 = arith.mulf %18, %25 : vector<2x128xf32>
    %c0_18 = arith.constant 0 : index
    %c0_19 = arith.constant 0 : index
    %27 = vector.load %arg7[%c0_18, %c0_19] : memref<2x128xf32, #tpu.memory_space<vmem>>, vector<2x128xf32>
    tpu.vector_store %arg7[%c0_18, %c0_19], %26 {strides = array<i32>} : memref<2x128xf32, #tpu.memory_space<vmem>>, vector<2x128xf32>,
    return
  }
}

</mosaic_0001>

<bundles_post_ra>
// kernel: tpu_custom_call.1
= control target key start
LH: loop header
LB: loop body
LE: loop exit
PB: predicated region body
PF: predicated region fallthrough
CT: control target
= control target key end

     0   :  { %12 = vsyncpa [#allocation3], 0  ;;  %s719_s0 = inlined_call_operand.hbm [shape: bf16[32,128], index: 0, kind: input, shape index: {}]   ;;  %s720_s1 = inlined_call_operand.hbm [shape: bf16[128,128], index: 1, kind: input, shape index: {}]   ;;  %s721_s2 = inlined_call_operand.vmem [shape: f32[1,128], index: 2, kind: input, shape index: {}]   ;;  %s722_s3 = inlined_call_operand.vmem [shape: f32[1,128], index: 3, kind: input, shape index: {}]   ;;  %s723_s4 = inlined_call_operand.vmem [shape: f32[2,32], index: 4, kind: input, shape index: {}]   ;;  %s724_s5 = inlined_call_operand.hbm [shape: bf16[128,128], index: 5, kind: input, shape index: {}]   ;;  %s725_s6 = inlined_call_operand.vmem [shape: f32[1,128], index: 6, kind: input, shape index: {}]   ;;  %s726_s7 = inlined_call_operand.hbm [shape: f32[2,128], index: 7, kind: output, shape index: {}]  }
   0x1   :  { %13 = vsyncpa [#allocation6], 0 }
   0x2   :  { %14 = vsyncpa [#allocation4], 0  ;;  %s647_s24 = smov [#allocation5]   ;;  %s648_s26 = smov [#allocation2]  }
   0x3   :  { %s32_s25 = sshll.u32 %s647_s24, 4  ;;  %s20_s27 = sshll.u32 %s648_s26, 4  ;;  %s33_s25 = int_to_ptr.vmem [resolvable:$true] %s32_s25  ;;  %s21_s27 = int_to_ptr.vmem [resolvable:$true] %s20_s27 }
   0x4   :  { %s569_s28 = scalar_lea.vmem %s33_s25, 1024  ;;  %p574_p1 = scmp.lt.s32.totalorder %s33_s25, %s33_s25 }
   0x5   :  { %p570_p0 = scmp.ne.s32.totalorder %s33_s25, %s569_s28  ;;  %p575_p2 = scmp.lt.s32.totalorder %s569_s28, %s569_s28 }
   0x7   :  { %p576_p3 = por %p575_p2, %p574_p1 }
   0x9   :  { %p577_p4 = pnand %p576_p3, %p570_p0 }
   0xb   :  { %580 = shalt.err (!%p577_p4)
}
   0xc   :  { %s649_s29 = smov 64   ;;  %s650_s30 = smov 4  }
   0xd   :  { %38 = dma.hbm_to_vmem [thread:$0]  %s720_s1, 1024, %s33_s25, [#allocation6], %s649_s29, %s649_s29, %s650_s30  }
   0xe   :  { %s589_s10 = scalar_lea.vmem %s21_s27, 256  ;;  %p594_p6 = scmp.lt.s32.totalorder %s21_s27, %s21_s27 }
   0xf   :  { %p590_p5 = scmp.ne.s32.totalorder %s21_s27, %s589_s10  ;;  %p595_p7 = scmp.lt.s32.totalorder %s589_s10, %s589_s10 }
  0x11   :  { %p596_p8 = por %p595_p7, %p594_p6 }
  0x13   :  { %p597_p9 = pnand %p596_p8, %p590_p5 }
  0x15   :  { %600 = shalt.err (!%p597_p9)
}
  0x16   :  { %26 = dma.hbm_to_vmem [thread:$0]  %s719_s0, 256, %s21_s27, [#allocation3], %s649_s29, %s649_s29, %s650_s30  }
  0x17   :  { %s651_s13 = smov [#allocation7]  }
  0x18   :  { %s50_s14 = sshll.u32 %s651_s13, 4  ;;  %s51_s14 = int_to_ptr.vmem [resolvable:$true] %s50_s14 }
  0x19   :  { %s609_s15 = scalar_lea.vmem %s51_s14, 1024  ;;  %p614_p11 = scmp.lt.s32.totalorder %s51_s14, %s51_s14 }
  0x1a   :  { %p610_p10 = scmp.ne.s32.totalorder %s51_s14, %s609_s15  ;;  %p615_p12 = scmp.lt.s32.totalorder %s609_s15, %s609_s15 }
  0x1c   :  { %p616_p13 = por %p615_p12, %p614_p11 }
  0x1e   :  { %p617_p0 = pnand %p616_p13, %p610_p10 }
  0x20   :  { %620 = shalt.err (!%p617_p0)
}
  0x21   :  { %56 = dma.hbm_to_vmem [thread:$0]  %s724_s5, 1024, %s51_s14, [#allocation6], %s649_s29, %s649_s29, %s650_s30  }
  0x22   :  { %641 = dma.done.wait [#allocation3], 256  }
  0x23   :  { %642 = vsyncadd [#allocation3], 4294967040 }
  0x24   :  { %643 = dma.done.wait [#allocation6], 2048  }
  0x25   :  { %644 = vsyncadd [#allocation6], 4294965248  ;;  %v541_v0 = vld [vmem:[#allocation5 + $0x38] sm:$0xff]   ;;  %v542_v1 = vld [vmem:[#allocation5 + $0x30] sm:$0xff]   ;;  %v652_v10 = vmov 0.0   ;;  %vm653_vm0 = vmmov 0  }
  0x26   :  { %482 = vmatprep.subr.bf16.mxu0 %v541_v0  ;;  %v543_v2 = vld [vmem:[#allocation5 + $0x28] sm:$0xff]   ;;  %v544_v3 = vld [vmem:[#allocation5 + $0x20] sm:$0xff]   ;;  %v549_v4 = vld [vmem:[#allocation2] sm:$0xff]   ;;  %513 = vmatprep.subr.bf16.mxu1 %v652_v10  ;;  %vm225_vm1 = vcmask 261120   ;;  %vm412_vm2 = vcmask 1041408  }
  0x27   :  { %483 = vmatpush3.bf16.msra.mxu0 %v541_v0  ;;  %v545_v5 = vld [vmem:[#allocation5 + $0x18] sm:$0xff]   ;;  %498 = vmatprep.mubr.bf16.mxu0 %v549_v4  ;;  %v546_v6 = vld [vmem:[#allocation5 + $0x10] sm:$0xff]   ;;  %v547_v7 = vld [vmem:[#allocation5 + $0x8] sm:$0xff]  }
  0x28   :  { %484 = vmatprep.subr.bf16.mxu0 %v542_v1  ;;  %v548_v8 = vld [vmem:[#allocation5] sm:$0xff]   ;;  %v550_v9 = vld [vmem:[#allocation2 + $0x8] sm:$0xff]   ;;  %529 = vmatprep.mubr.msk.bf16.mxu1 %vm653_vm0, %v652_v10  ;;  %v552_v12 = vld [vmem:[#allocation7 + $0x30] sm:$0xff]  }
  0x29   :  { %v551_v11 = vld [vmem:[#allocation7 + $0x38] sm:$0xff]   ;;  %v553_v13 = vld [vmem:[#allocation7 + $0x28] sm:$0xff]   ;;  %v554_v14 = vld [vmem:[#allocation7 + $0x20] sm:$0xff]  }
  0x2a   :  { %514 = vmatpush3.bf16.msra.mxu1 %v551_v11  ;;  %v555_v15 = vld [vmem:[#allocation7 + $0x18] sm:$0xff]   ;;  %v556_v16 = vld [vmem:[#allocation7 + $0x10] sm:$0xff]   ;;  %v557_v17 = vld [vmem:[#allocation7 + $0x8] sm:$0xff]  }
  0x2b   :  { %485 = vmatpush3.bf16.msra.mxu0 %v542_v1  ;;  %515 = vmatprep.subr.bf16.mxu1 %v652_v10  ;;  %v446_v19 = vld [vmem:[%s721_s2] ss:$0 sm:$0xff]  ;;  %v558_v37 = vld [vmem:[#allocation7] sm:$0xff]  }
  0x2c   :  { %486 = vmatprep.subr.bf16.mxu0 %v543_v2  ;;  %v447_v22 = vld [vmem:[%s722_s3] ss:$0 sm:$0xff] }
  0x2d   :  { %v224_v36 = vld [vmem:[%s723_s4] sm:$0x3]  ;;  %s654_s4 = smov [#allocation8]  }
  0x2e   :  { %516 = vmatpush3.bf16.msra.mxu1 %v552_v12  ;;  %v449_v41 = vld [vmem:[%s725_s6] ss:$0 sm:$0xff]  ;;  %s426_s21 = sshll.u32 %s654_s4, 4  ;;  %s427_s21 = int_to_ptr.vmem [resolvable:$true] %s426_s21 }
  0x2f   :  { %487 = vmatpush3.bf16.msra.mxu0 %v543_v2  ;;  %517 = vmatprep.subr.bf16.mxu1 %v652_v10  ;;  %s621_s22 = scalar_lea.vmem %s427_s21, 32  ;;  %p626_p2 = scmp.lt.s32.totalorder %s427_s21, %s427_s21 }
  0x30   :  { %488 = vmatprep.subr.bf16.mxu0 %v544_v3  ;;  %p622_p1 = scmp.ne.s32.totalorder %s427_s21, %s621_s22  ;;  %p627_p3 = scmp.lt.s32.totalorder %s621_s22, %s621_s22 }
  0x32   :  { %518 = vmatpush3.bf16.msra.mxu1 %v553_v13  ;;  %p628_p4 = por %p627_p3, %p626_p2 }
  0x33   :  { %489 = vmatpush3.bf16.msra.mxu0 %v544_v3  ;;  %519 = vmatprep.subr.bf16.mxu1 %v652_v10 }
  0x34   :  { %490 = vmatprep.subr.bf16.mxu0 %v545_v5  ;;  %p629_p5 = pnand %p628_p4, %p622_p1 }
  0x36   :  { %520 = vmatpush3.bf16.msra.mxu1 %v554_v14 }
  0x37   :  { %491 = vmatpush3.bf16.msra.mxu0 %v545_v5  ;;  %521 = vmatprep.subr.bf16.mxu1 %v652_v10 }
  0x38   :  { %492 = vmatprep.subr.bf16.mxu0 %v546_v6 }
  0x3a   :  { %522 = vmatpush3.bf16.msra.mxu1 %v555_v15 }
  0x3b   :  { %493 = vmatpush3.bf16.msra.mxu0 %v546_v6  ;;  %523 = vmatprep.subr.bf16.mxu1 %v652_v10 }
  0x3c   :  { %494 = vmatprep.subr.bf16.mxu0 %v547_v7 }
  0x3e   :  { %524 = vmatpush3.bf16.msra.mxu1 %v556_v16 }
  0x3f   :  { %495 = vmatpush3.bf16.msra.mxu0 %v547_v7  ;;  %525 = vmatprep.subr.bf16.mxu1 %v652_v10 }
  0x40   :  { %496 = vmatprep.subr.bf16.mxu0 %v548_v8 }
  0x42   :  { %526 = vmatpush3.bf16.msra.mxu1 %v557_v17 }
  0x43   :  { %497 = vmatpush3.bf16.msra.mxu0 %v548_v8  ;;  %527 = vmatprep.subr.bf16.mxu1 %v652_v10 }
  0x44   :  { %502 = vmatprep.subr.mxu0 %v652_v10 }
  0x46   :  { %499 = vmatmul.mubr.bf16.vlgmr.msra.gmra.mxu0 %v550_v9  ;;  %528 = vmatpush3.bf16.msra.mxu1 %v558_v37 }
  0x47   :  { %510 = vmatprep.mubr.msk.f32.mxu0 %vm653_vm0, %v652_v10 }
 0x106   :  { %v500_v18 = vpop.f32.mrf.mxu0 }
 0x107   :  { %v207_v21 = vmul.f32 %v500_v18, %v446_v19 }
 0x108   :  { %v183_v20 = vpop.f32.mrf.mxu0 }
 0x109   :  { %v218_v26 = vadd.f32 %v447_v22, %v207_v21  ;;  %v205_v27 = vmul.f32 %v446_v19, %v183_v20 }
 0x10a   :  { %v501_v23 = vpop.f32.mrf.mxu0 }
 0x10b   :  { %v208_v24 = vmul.f32 %v501_v23, %v446_v19  ;;  %v222_v32 = vmax.f32 %v218_v26, 0.0  ;;  %v216_v33 = vadd.f32 %v447_v22, %v205_v27 }
 0x10c   :  { %v186_v25 = vpop.f32.mrf.mxu0 }
 0x10d   :  { %v219_v28 = vadd.f32 %v447_v22, %v208_v24  ;;  %v206_v29 = vmul.f32 %v446_v19, %v186_v25  ;;  %v220_v35 = vmax.f32 %v216_v33, 0.0 }
 0x10f   :  { %v223_v30 = vmax.f32 %v219_v28, 0.0  ;;  %v217_v31 = vadd.f32 %v447_v22, %v206_v29 }
 0x111   :  { %503 = vmatpush3.msra.mxu0 %v223_v30  ;;  %v221_v34 = vmax.f32 %v217_v31, 0.0 }
 0x112   :  { %504 = vmatprep.subr.mxu0 %v652_v10 }
 0x113   :  { %505 = vmatpush3.msra.mxu0 %v222_v32 }
 0x114   :  { %506 = vmatprep.subr.mxu0 %v652_v10 }
 0x115   :  { %507 = vmatpush3.msra.mxu0 %v221_v34 }
 0x116   :  { %508 = vmatprep.subr.mxu0 %v652_v10 }
 0x117   :  { %509 = vmatpush3.msra.mxu0 %v220_v35 }
 0x118   :  { %511 = vmatmul.mubr.msk.f32.vlgmr.msra.gmra.mxu0 %vm225_vm1, %v224_v36 }
 0x1d8   :  { %v295_v38 = vpop.f32.mrf.mxu0 }
 0x1d9   :  { %v299_v39 = vpack.c.bf16 %v295_v38, %v295_v38 }
 0x1da   :  { %v512_v40 = vpop.f32.mrf.mxu0 }
 0x1db   :  { %530 = vmatmul.mubr.bf16.vlgmr.msra.gmra.mxu1 %v299_v39 }
 0x29b   :  { %v405_v42 = vpop.f32.mrf.mxu1 }
 0x29c   :  { %v406_v43 = vadd.f32 %v449_v41, %v405_v42 }
 0x29d   :  { %v531_v44 = vpop.f32.mrf.mxu1 }
 0x29e   :  { %v411_v45 = vmul.f32 %v406_v43, %v406_v43 }
 0x29f   :  { %v408_v46 = vpop.f32.mrf.mxu1 }
 0x2a0   :  { %v413_v47 = vsel %vm412_vm2, %v411_v45, 0.0 }
 0x2a1   :  { %v532_v48 = vpop.f32.mrf.mxu1  ;;  %414 = vadd.xlane.f32.xlu0 %v413_v47 }
 0x32a   :  { %v415_v49 = vpop.xlane.xlu0 %414 }
 0x32b   :  { %v416_v50 = vmax.f32 %v415_v49, 1e-24 }
 0x32d   :  { %559 = vrsqrt.f32 %v416_v50 }
 0x33a   :  { %v560_v51 = vpop.eup %559 }
 0x33b   :  { %v418_v52 = vmul.f32 %v560_v51, %v406_v43 }
 0x33d   :  { %419 = vst [vmem:[#allocation8] sm:$0x3] %v418_v52 }
 0x33e   :  { %632 = shalt.err (!%p629_p5)
}
 0x33f   :  { %429 = dma.vmem_to_hbm [thread:$0]  %s427_s21, 32, %s726_s7, [#allocation4]  }
 0x340   :  { %645 = dma.done.wait [#allocation4], 32  }
 0x341   :  { %646 = vsyncadd [#allocation4], 4294967264 }
 0x342   :  { %433 = vsyncpa [#allocation3], 1 }
 0x343   :  { %434 = vsyncpa [#allocation6], 1 }
 0x344   :  { %435 = vsyncpa [#allocation4], 1 }

</bundles_post_ra>
